<compile_context>
chip_gen: v7x
topology: tpu7x:2x2x1
jax: 0.10.0
libtpu: 0.0.40
codegen_flags: <defaults>
</compile_context>

<pallas_src>
import functools
import math

import jax
import jax.numpy as jnp
from jax.experimental import pallas as pl
from jax.experimental.pallas import tpu as pltpu


ALPHA = 0.25
GAMMA = 2.0


def _cdiv(a, b):
    return -(-a // b)


def _round_up(x, m):
    return ((x + m - 1) // m) * m


def _default_n_par():
    """2 on megacore chips (2 TensorCores/chip: v4, v5p, v7x), else 1."""
    try:
        kind = jax.devices()[0].device_kind.lower()
    except Exception:
        return 1
    for tag in ("v7", "v5p", "v4"):
        if tag in kind:
            return 2
    return 1


def _focal_loss_kernel(logits_ref, targets_ref, out_ref, *,
                       alpha, gamma, total_elems, tile_rows, tiles_per_slice,
                       lane, first_masked_block, needs_mask):
    t_idx = pl.program_id(1)

    @pl.when(t_idx == 0)
    def _init():
        out_ref[...] = jnp.zeros_like(out_ref)

    x = logits_ref[...].astype(jnp.float32)
    t = targets_ref[...].astype(jnp.float32)

    # One shared exponential feeds both the stable BCE term and the sigmoid.
    e = jnp.exp(-jnp.abs(x))                        # single EUP exp / element
    # Numerically-stable BCE-with-logits (matches F.binary_cross_entropy_with_logits)
    ce = jnp.maximum(x, 0.0) - x * t + jnp.log1p(e)

    # sigmoid(x) = 1/(1+e) for x>=0, e/(1+e) for x<0, with the same e.
    one_plus_e = 1.0 + e
    inv = pl.reciprocal(one_plus_e, approx=True)    # EUP vrcp (cheap slot)
    inv = inv * (2.0 - one_plus_e * inv)            # one Newton step -> ~f32 exact
    probs = jnp.where(x >= 0.0, inv, e * inv)

    # 1 - p_t  ==  probs + t - 2*probs*t   (p_t never materialized)
    w = probs + t - 2.0 * (probs * t)
    if gamma == 2.0:
        focal_weight = alpha * (w * w)              # explicit square: no pow->exp/log
    else:
        focal_weight = alpha * (w ** gamma)
    focal = focal_weight * ce

    def _accumulate(vals):
        # vreg-shaped accumulation: VPU tree-add only; no per-step cross-lane reduce.
        out_ref[...] += jnp.sum(vals.reshape(tile_rows // 8, 8, lane), axis=0)

    if needs_mask:
        block = pl.program_id(0) * tiles_per_slice + t_idx

        @pl.when(block < first_masked_block)
        def _fast():                                # bulk of tiles: no mask math
            _accumulate(focal)

        @pl.when(block >= first_masked_block)
        def _tail():                                # only the ragged final block(s)
            # TODO(synk): gidx is int32; for inputs beyond ~2^31 elements switch
            # to a per-block remaining-count compare.
            row_ids = jax.lax.broadcasted_iota(jnp.int32, (tile_rows, lane), 0)
            col_ids = jax.lax.broadcasted_iota(jnp.int32, (tile_rows, lane), 1)
            gidx = (block * tile_rows + row_ids) * lane + col_ids
            _accumulate(jnp.where(gidx < total_elems, focal, 0.0))
    else:
        _accumulate(focal)


def focal_loss(logits, targets, *, alpha=ALPHA, gamma=GAMMA,
               rows_per_tile=2048, lane=128, n_par=None):
    """Mean sigmoid focal loss over all elements of logits/targets (any shape)."""
    assert logits.shape == targets.shape
    total = math.prod(logits.shape)
    assert total > 0

    if n_par is None:
        n_par = _default_n_par()

    # Row granule = sublane packing of the narrowest streamed dtype
    # (8 rows for 4-byte, 16 for 2-byte, 32 for 1-byte).  Inputs keep their
    # native dtype (no wrapper astype copy); the kernel upcasts to f32.
    itemsize = min(jnp.dtype(logits.dtype).itemsize,
                   jnp.dtype(targets.dtype).itemsize)
    granule = max(8, 32 // max(1, itemsize))

    flat_logits = logits.reshape(-1)
    flat_targets = targets.reshape(-1)

    # Pad only to the next (granule*lane)-element boundary; the ragged final
    # Pallas block is masked in-kernel instead of padding out the whole grid.
    padded_total = _round_up(total, granule * lane)
    pad = padded_total - total
    if pad:
        flat_logits = jnp.pad(flat_logits, (0, pad))
        flat_targets = jnp.pad(flat_targets, (0, pad))

    rows = padded_total // lane
    if rows < n_par * granule:          # tiny input: sharding buys nothing
        n_par = 1

    rows_per_tile = _round_up(max(granule, min(rows_per_tile, rows)), granule)
    rows_per_slice = _cdiv(rows, n_par)
    tile_rows = min(rows_per_tile, _round_up(rows_per_slice, granule))
    tiles_per_slice = _cdiv(rows_per_slice, tile_rows)
    n_blocks_real = _cdiv(rows, tile_rows)
    max_block = n_blocks_real - 1

    coverage_elems = n_par * tiles_per_slice * tile_rows * lane
    needs_mask = coverage_elems != total
    first_masked_block = total // (tile_rows * lane)

    logits2d = flat_logits.reshape(rows, lane)
    targets2d = flat_targets.reshape(rows, lane)

    def in_index_map(p, t):
        # Clamp so a (rare) fully out-of-range trailing block re-reads the
        # last valid block; its contribution is masked to zero in-kernel.
        return (jnp.minimum(p * tiles_per_slice + t, max_block), 0)

    kernel = functools.partial(
        _focal_loss_kernel, alpha=alpha, gamma=gamma, total_elems=total,
        tile_rows=tile_rows, tiles_per_slice=tiles_per_slice, lane=lane,
        first_masked_block=first_masked_block, needs_mask=needs_mask)

    # Real pipelined footprint: 2 inputs x 2 buffers x tile bytes (+ slack).
    tile_bytes = tile_rows * lane * 4
    vmem_limit = max(16 * 1024 * 1024, 4 * tile_bytes + 8 * 1024 * 1024)

    partials = pl.pallas_call(
        kernel,
        out_shape=jax.ShapeDtypeStruct((n_par * 8, lane), jnp.float32),
        grid_spec=pltpu.PrefetchScalarGridSpec(
            num_scalar_prefetch=0,
            grid=(n_par, tiles_per_slice),
            in_specs=[
                pl.BlockSpec((tile_rows, lane), in_index_map),
                pl.BlockSpec((tile_rows, lane), in_index_map),
            ],
            out_specs=pl.BlockSpec((8, lane), lambda p, t: (p, 0)),
        ),
        compiler_params=pltpu.CompilerParams(
            dimension_semantics=("parallel", "arbitrary"),
            vmem_limit_bytes=vmem_limit,
        ),
    )(logits2d, targets2d)

    # Single cross-lane/cross-sublane reduction, once, outside the hot loop.
    return jnp.sum(partials) / jnp.float32(total)


def _focal_loss_ref(logits, targets, alpha=ALPHA, gamma=GAMMA):
    x = logits.astype(jnp.float32)
    t = targets.astype(jnp.float32)
    probs = jax.nn.sigmoid(x)
    ce = jnp.maximum(x, 0.0) - x * t + jnp.log1p(jnp.exp(-jnp.abs(x)))
    p_t = probs * t + (1.0 - probs) * (1.0 - t)
    w = alpha * (1.0 - p_t) ** gamma
    return jnp.mean(w * ce)


if __name__ == "__main__":
    key = jax.random.PRNGKey(0)
    k1, k2 = jax.random.split(key)

    # NCHW inputs, small shapes: batch=2, channels=4, spatial=16x16
    logits = jax.random.normal(k1, (2, 4, 16, 16), dtype=jnp.float32) * 2.0
    targets = (jax.random.uniform(k2, (2, 4, 16, 16)) > 0.5).astype(jnp.float32)

    loss = focal_loss(logits, targets)
    loss = jax.block_until_ready(loss)

    ref = _focal_loss_ref(logits, targets)
    assert jnp.allclose(loss, ref, rtol=1e-5, atol=1e-6), (loss, ref)

    print("KERNEL_OK")
</pallas_src>

<mosaic_0001>
module attributes {stable_mosaic.version = 11 : i64} {
  func.func @_focal_loss_kernel(%arg0: i32, %arg1: i32, %arg2: memref<16x128xf32, #tpu.memory_space<vmem>>, %arg3: memref<16x128xf32, #tpu.memory_space<vmem>>, %arg4: memref<8x128xf32, #tpu.memory_space<vmem>>) attributes {dimension_semantics = [#tpu.dimension_semantics<parallel>, #tpu.dimension_semantics<arbitrary>], iteration_bounds = array<i64: 1, 1>, scalar_prefetch = 0 : i64, scratch_operands = 0 : i64, tpu.core_type = #tpu.core_type<tc>, window_params = [{transform_indices = @transform_0, window_bounds = array<i64: 16, 128>}, {transform_indices = @transform_1, window_bounds = array<i64: 16, 128>}, {transform_indices = @transform_2, window_bounds = array<i64: 8, 128>}]} {
    %c0_i32 = arith.constant 0 : i32
    %0 = arith.cmpi eq, %arg1, %c0_i32 : i32
    %1 = arith.extui %0 : i1 to i32
    %c0_i32_0 = arith.constant 0 : i32
    %2 = arith.cmpi ne, %1, %c0_i32_0 : i32
    scf.if %2 {
      %cst_15 = arith.constant 0.000000e+00 : f32
      %40 = vector.broadcast %cst_15 : f32 to vector<8x128xf32>
      %c0_16 = arith.constant 0 : index
      %c0_17 = arith.constant 0 : index
      %41 = vector.load %arg4[%c0_16, %c0_17] : memref<8x128xf32, #tpu.memory_space<vmem>>, vector<8x128xf32>
      tpu.vector_store %arg4[%c0_16, %c0_17], %40 {strides = array<i32>} : memref<8x128xf32, #tpu.memory_space<vmem>>, vector<8x128xf32>,
    } else {
    }
    %c0 = arith.constant 0 : index
    %c0_1 = arith.constant 0 : index
    %3 = vector.load %arg2[%c0, %c0_1] : memref<16x128xf32, #tpu.memory_space<vmem>>, vector<16x128xf32>
    %c0_2 = arith.constant 0 : index
    %c0_3 = arith.constant 0 : index
    %4 = vector.load %arg3[%c0_2, %c0_3] : memref<16x128xf32, #tpu.memory_space<vmem>>, vector<16x128xf32>
    %5 = math.absf %3 : vector<16x128xf32>
    %cst = arith.constant 0.000000e+00 : f32
    %6 = vector.broadcast %cst : f32 to vector<16x128xf32>
    %7 = arith.subf %6, %5 : vector<16x128xf32>
    %8 = math.exp %7 : vector<16x128xf32>
    %cst_4 = arith.constant 0.000000e+00 : f32
    %9 = vector.broadcast %cst_4 : f32 to vector<16x128xf32>
    %10 = arith.maximumf %3, %9 : vector<16x128xf32>
    %11 = arith.mulf %3, %4 : vector<16x128xf32>
    %12 = arith.subf %10, %11 : vector<16x128xf32>
    %13 = math.log1p %8 : vector<16x128xf32>
    %14 = arith.addf %12, %13 : vector<16x128xf32>
    %cst_5 = arith.constant 1.000000e+00 : f32
    %15 = vector.broadcast %cst_5 : f32 to vector<16x128xf32>
    %16 = arith.addf %15, %8 : vector<16x128xf32>
    %17 = tpu.reciprocal %16 {approx = true} : vector<16x128xf32> -> vector<16x128xf32>
    %18 = arith.mulf %16, %17 : vector<16x128xf32>
    %cst_6 = arith.constant 2.000000e+00 : f32
    %19 = vector.broadcast %cst_6 : f32 to vector<16x128xf32>
    %20 = arith.subf %19, %18 : vector<16x128xf32>
    %21 = arith.mulf %17, %20 : vector<16x128xf32>
    %cst_7 = arith.constant 0.000000e+00 : f32
    %22 = vector.broadcast %cst_7 : f32 to vector<16x128xf32>
    %23 = arith.cmpf oge, %3, %22 : vector<16x128xf32>
    %24 = arith.mulf %8, %21 : vector<16x128xf32>
    %25 = arith.select %23, %21, %24 : vector<16x128xi1>, vector<16x128xf32>
    %26 = arith.addf %25, %4 : vector<16x128xf32>
    %27 = arith.mulf %25, %4 : vector<16x128xf32>
    %cst_8 = arith.constant 2.000000e+00 : f32
    %28 = vector.broadcast %cst_8 : f32 to vector<16x128xf32>
    %29 = arith.mulf %28, %27 : vector<16x128xf32>
    %30 = arith.subf %26, %29 : vector<16x128xf32>
    %31 = arith.mulf %30, %30 : vector<16x128xf32>
    %cst_9 = arith.constant 2.500000e-01 : f32
    %32 = vector.broadcast %cst_9 : f32 to vector<16x128xf32>
    %33 = arith.mulf %32, %31 : vector<16x128xf32>
    %34 = arith.mulf %33, %14 : vector<16x128xf32>
    %c0_10 = arith.constant 0 : index
    %c0_11 = arith.constant 0 : index
    %35 = vector.load %arg4[%c0_10, %c0_11] : memref<8x128xf32, #tpu.memory_space<vmem>>, vector<8x128xf32>
    %36 = vector.shape_cast %34 : vector<16x128xf32> to vector<2x8x128xf32>
    %cst_12 = arith.constant dense<0.000000e+00> : vector<8x128xf32>
    %37 = vector.multi_reduction <add>, %36, %cst_12 [0] : vector<2x8x128xf32> to vector<8x128xf32>
    %38 = arith.addf %35, %37 : vector<8x128xf32>
    %c0_13 = arith.constant 0 : index
    %c0_14 = arith.constant 0 : index
    %39 = vector.load %arg4[%c0_13, %c0_14] : memref<8x128xf32, #tpu.memory_space<vmem>>, vector<8x128xf32>
    tpu.vector_store %arg4[%c0_13, %c0_14], %38 {strides = array<i32>} : memref<8x128xf32, #tpu.memory_space<vmem>>, vector<8x128xf32>,
    return
  }
  func.func @transform_0(%arg0: i32, %arg1: i32) -> (i32, i32) {
    %c1_i32 = arith.constant 1 : i32
    %0 = arith.muli %arg0, %c1_i32 : i32
    %1 = arith.addi %0, %arg1 : i32
    %c0_i32 = arith.constant 0 : i32
    %2 = arith.minsi %1, %c0_i32 : i32
    %c0_i32_0 = arith.constant 0 : i32
    %c0_i32_1 = arith.constant 0 : i32
    return %2, %c0_i32_0 : i32, i32
  }
  func.func @transform_1(%arg0: i32, %arg1: i32) -> (i32, i32) {
    %c1_i32 = arith.constant 1 : i32
    %0 = arith.muli %arg0, %c1_i32 : i32
    %1 = arith.addi %0, %arg1 : i32
    %c0_i32 = arith.constant 0 : i32
    %2 = arith.minsi %1, %c0_i32 : i32
    %c0_i32_0 = arith.constant 0 : i32
    %c0_i32_1 = arith.constant 0 : i32
    return %2, %c0_i32_0 : i32, i32
  }
  func.func @transform_2(%arg0: i32, %arg1: i32) -> (i32, i32) {
    %c0_i32 = arith.constant 0 : i32
    %c0_i32_0 = arith.constant 0 : i32
    return %arg0, %c0_i32 : i32, i32
  }
}

</mosaic_0001>

<bundles_post_ra>
// kernel: tpu_custom_call.1
= control target key start
LH: loop header
LB: loop body
LE: loop exit
PB: predicated region body
PF: predicated region fallthrough
CT: control target
= control target key end

     0   :  { %7 = vsyncpa [#allocation3], 0  ;;  %s309_s0 = inlined_call_operand.hbm [shape: f32[16,128], index: 0, kind: input, shape index: {}]   ;;  %s310_s1 = inlined_call_operand.hbm [shape: f32[16,128], index: 1, kind: input, shape index: {}]   ;;  %s311_s2 = inlined_call_operand.hbm [shape: f32[8,128], index: 2, kind: output, shape index: {}]  }
   0x1   :  { %8 = vsyncpa [#allocation6], 0 }
   0x2   :  { %9 = vsyncpa [#allocation4], 0  ;;  %s247_s9 = smov [#allocation2]   ;;  %s175_s13 = scalar_lea.hbm %s309_s0, 256 }
   0x3   :  { %s21_s10 = sshll.u32 %s247_s9, 4  ;;  %p176_p0 = scmp.ne.s32.totalorder %s309_s0, %s175_s13  ;;  %s22_s10 = int_to_ptr.vmem [resolvable:$true] %s21_s10 }
   0x4   :  { %p179_p1 = scmp.lt.u32.totalorder %s175_s13, %s309_s0 }
   0x6   :  { %p181_p2 = pnand %p179_p1, %p176_p0 }
   0x8   :  { %184 = shalt.err (!%p181_p2)
}
   0x9   :  { %s185_s18 = scalar_lea.vmem %s22_s10, 256  ;;  %p190_p4 = scmp.lt.s32.totalorder %s22_s10, %s22_s10 }
   0xa   :  { %p186_p3 = scmp.ne.s32.totalorder %s22_s10, %s185_s18  ;;  %p191_p5 = scmp.lt.s32.totalorder %s185_s18, %s185_s18 }
   0xc   :  { %p192_p6 = por %p191_p5, %p190_p4 }
   0xe   :  { %p193_p7 = pnand %p192_p6, %p186_p3 }
  0x10   :  { %196 = shalt.err (!%p193_p7)
}
  0x11   :  { %s248_s19 = smov 128   ;;  %s249_s20 = smov 8  }
  0x12   :  { %27 = dma.hbm_to_vmem [thread:$0]  %s309_s0, 256, %s22_s10, [#allocation3], %s248_s19, %s248_s19, %s249_s20  }
  0x13   :  { %s250_s23 = smov [#allocation5]   ;;  %s197_s27 = scalar_lea.hbm %s310_s1, 256 }
  0x14   :  { %s39_s24 = sshll.u32 %s250_s23, 4  ;;  %p198_p8 = scmp.ne.s32.totalorder %s310_s1, %s197_s27  ;;  %s40_s24 = int_to_ptr.vmem [resolvable:$true] %s39_s24 }
  0x15   :  { %p201_p9 = scmp.lt.u32.totalorder %s197_s27, %s310_s1 }
  0x17   :  { %p203_p10 = pnand %p201_p9, %p198_p8 }
  0x19   :  { %206 = shalt.err (!%p203_p10)
}
  0x1a   :  { %s207_s4 = scalar_lea.vmem %s40_s24, 256  ;;  %p212_p12 = scmp.lt.s32.totalorder %s40_s24, %s40_s24 }
  0x1b   :  { %p208_p11 = scmp.ne.s32.totalorder %s40_s24, %s207_s4  ;;  %p213_p13 = scmp.lt.s32.totalorder %s207_s4, %s207_s4 }
  0x1d   :  { %p214_p0 = por %p213_p13, %p212_p12 }
  0x1f   :  { %p215_p1 = pnand %p214_p0, %p208_p11 }
  0x21   :  { %218 = shalt.err (!%p215_p1)
}
  0x22   :  { %45 = dma.hbm_to_vmem [thread:$0]  %s310_s1, 256, %s40_s24, [#allocation6], %s248_s19, %s248_s19, %s249_s20  }
  0x23   :  { %241 = dma.done.wait [#allocation3], 256  }
  0x24   :  { %242 = vsyncadd [#allocation3], 4294967040 }
  0x25   :  { %243 = dma.done.wait [#allocation6], 256  }
  0x26   :  { %244 = vsyncadd [#allocation6], 4294967040  ;;  %v65_v0 = vld [vmem:[#allocation2] sm:$0xff]  ;;  %v66_v1 = vld [vmem:[#allocation2 + $0x8] sm:$0xff]  ;;  %s251_s1 = smov [#allocation7]  }
  0x27   :  { %v69_v2 = vand.u32 2147483647, %v65_v0  ;;  %v70_v3 = vand.u32 2147483647, %v66_v1  ;;  %v67_v25 = vld [vmem:[#allocation5] sm:$0xff]  ;;  %v77_v26 = vmax.f32 %v65_v0, 0.0 }
  0x28   :  { %vm113_vm0 = vcmp.ge.f32.partialorder %v65_v0, 0.0  ;;  %v68_v29 = vld [vmem:[#allocation5 + $0x8] sm:$0xff]  ;;  %v79_v30 = vmul.f32 %v67_v25, %v65_v0  ;;  %vm114_vm1 = vcmp.ge.f32.partialorder %v66_v1, 0.0  ;;  %v78_v33 = vmax.f32 %v66_v1, 0.0  ;;  %s143_s6 = sshll.u32 %s251_s1, 4  ;;  %s144_s6 = int_to_ptr.vmem [resolvable:$true] %s143_s6 }
  0x29   :  { %v71_v4 = vsub.f32 0.0, %v69_v2  ;;  %v72_v5 = vsub.f32 0.0, %v70_v3  ;;  %v80_v34 = vmul.f32 %v68_v29, %v66_v1  ;;  %s219_s7 = scalar_lea.vmem %s144_s6, 128  ;;  %p224_p3 = scmp.lt.s32.totalorder %s144_s6, %s144_s6 }
  0x2a   :  { %v81_v47 = vsub.f32 %v77_v26, %v79_v30  ;;  %p220_p2 = scmp.ne.s32.totalorder %s144_s6, %s219_s7  ;;  %p225_p4 = scmp.lt.s32.totalorder %s219_s7, %s219_s7 }
  0x2b   :  { %v73_v6 = vmul.f32 1.442695, %v71_v4  ;;  %v75_v7 = vmul.f32 1.442695, %v72_v5  ;;  %v82_v49 = vsub.f32 %v78_v33, %v80_v34 }
  0x2c   :  { %p226_p5 = por %p225_p4, %p224_p3 }
  0x2d   :  { %163 = vpow2.f32 %v73_v6 }
  0x2e   :  { %165 = vpow2.f32 %v75_v7  ;;  %p227_p6 = pnand %p226_p5, %p220_p2 }
  0x37   :  { %v164_v8 = vpop.eup %163 }
  0x38   :  { %v166_v9 = vpop.eup %165  ;;  %v83_v10 = vadd.f32 1.0, %v164_v8  ;;  %v86_v14 = vmul.f32 -0.5, %v164_v8  ;;  %v89_v19 = vand.u32 2147483647, %v164_v8 }
  0x39   :  { %v92_v11 = vadd.f32 1.0, %v166_v9  ;;  %v95_v15 = vmul.f32 -0.5, %v166_v9  ;;  %v98_v31 = vand.u32 2147483647, %v166_v9 }
  0x3a   :  { %167 = vrcp.f32 %v83_v10  ;;  %v87_v21 = vadd.f32 1.0, %v86_v14  ;;  %vm291_vm2 = vcmp.lt.f32.partialorder %v89_v19, 0.0004427343 }
  0x3b   :  { %169 = vrcp.f32 %v92_v11  ;;  %v96_v22 = vadd.f32 1.0, %v95_v15  ;;  %vm99_vm3 = vcmp.lt.f32.partialorder %v98_v31, 0.0004427343 }
  0x3c   :  { %171 = vlog2.f32 %v83_v10  ;;  %v88_v38 = vmul.f32 %v164_v8, %v87_v21 }
  0x3d   :  { %173 = vlog2.f32 %v92_v11  ;;  %v97_v39 = vmul.f32 %v166_v9, %v96_v22 }
  0x44   :  { %v168_v12 = vpop.eup %167 }
  0x45   :  { %v170_v13 = vpop.eup %169  ;;  %v107_v16 = vmul.f32 %v168_v12, %v83_v10 }
  0x46   :  { %v108_v17 = vmul.f32 %v170_v13, %v92_v11  ;;  %v172_v24 = vpop.eup %171 }
  0x47   :  { %v109_v18 = vsub.f32 2.0, %v107_v16  ;;  %v174_v28 = vpop.eup %173  ;;  %v85_v37 = vmul.f32 0.6931472, %v172_v24 }
  0x48   :  { %v110_v20 = vsub.f32 2.0, %v108_v17  ;;  %v94_v41 = vmul.f32 0.6931472, %v174_v28 }
  0x49   :  { %v111_v23 = vmul.f32 %v168_v12, %v109_v18  ;;  %v91_v50 = vsel %vm291_vm2, %v88_v38, %v85_v37 }
  0x4a   :  { %v112_v27 = vmul.f32 %v170_v13, %v110_v20  ;;  %v100_v52 = vsel %vm99_vm3, %v97_v39, %v94_v41  ;;  %v101_v55 = vadd.f32 %v91_v50, %v81_v47 }
  0x4b   :  { %v115_v32 = vmul.f32 %v164_v8, %v111_v23  ;;  %v102_v57 = vadd.f32 %v100_v52, %v82_v49 }
  0x4c   :  { %v116_v36 = vmul.f32 %v166_v9, %v112_v27 }
  0x4d   :  { %v117_v40 = vsel %vm113_vm0, %v111_v23, %v115_v32 }
  0x4e   :  { %v118_v42 = vsel %vm114_vm1, %v112_v27, %v116_v36  ;;  %v119_v43 = vadd.f32 %v117_v40, %v67_v25  ;;  %v121_v44 = vmul.f32 %v117_v40, %v67_v25 }
  0x4f   :  { %v120_v45 = vadd.f32 %v118_v42, %v68_v29  ;;  %v122_v46 = vmul.f32 %v118_v42, %v68_v29 }
  0x50   :  { %v123_v48 = vmul.f32 2.0, %v121_v44 }
  0x51   :  { %v124_v51 = vmul.f32 2.0, %v122_v46 }
  0x52   :  { %v125_v53 = vsub.f32 %v119_v43, %v123_v48 }
  0x53   :  { %v126_v54 = vsub.f32 %v120_v45, %v124_v51 }
  0x54   :  { %v127_v56 = vmul.f32 %v125_v53, %v125_v53 }
  0x55   :  { %v128_v58 = vmul.f32 %v126_v54, %v126_v54 }
  0x56   :  { %v129_v59 = vmul.f32 0.25, %v127_v56 }
  0x57   :  { %v130_v60 = vmul.f32 0.25, %v128_v58 }
  0x58   :  { %v131_v61 = vmul.f32 %v129_v59, %v101_v55 }
  0x59   :  { %v132_v62 = vmul.f32 %v130_v60, %v102_v57 }
  0x5b   :  { %v134_v63 = vadd.f32 %v132_v62, %v131_v61 }
  0x5d   :  { %136 = vst [vmem:[#allocation7] sm:$0xff] %v134_v63 }
  0x5e   :  { %230 = shalt.err (!%p227_p6)
}
  0x5f   :  { %s231_s10 = scalar_lea.hbm %s311_s2, 128 }
  0x60   :  { %p232_p7 = scmp.ne.s32.totalorder %s311_s2, %s231_s10  ;;  %p235_p8 = scmp.lt.u32.totalorder %s231_s10, %s311_s2 }
  0x62   :  { %p237_p9 = pnand %p235_p8, %p232_p7 }
  0x64   :  { %240 = shalt.err (!%p237_p9)
}
  0x65   :  { %146 = dma.vmem_to_hbm [thread:$0]  %s144_s6, 128, %s311_s2, [#allocation4]  }
  0x66   :  { %245 = dma.done.wait [#allocation4], 128  }
  0x67   :  { %246 = vsyncadd [#allocation4], 4294967168 }
  0x68   :  { %150 = vsyncpa [#allocation3], 1 }
  0x69   :  { %151 = vsyncpa [#allocation6], 1 }
  0x6a   :  { %152 = vsyncpa [#allocation4], 1 }

</bundles_post_ra>
